<compile_context>
chip_gen: v7x
topology: tpu7x:2x2x1
jax: 0.10.0
libtpu: 0.0.40
codegen_flags: <defaults>
</compile_context>

<pallas_src>
import functools

import jax
import jax.numpy as jnp
from jax.experimental import pallas as pl
from jax.experimental.pallas import tpu as pltpu


def _round_up(v, m):
    return ((v + m - 1) // m) * m


def _pad_to(arr, shape):
    pads = [(0, t - s) for s, t in zip(arr.shape, shape)]
    if all(p == (0, 0) for p in pads):
        return arr
    return jnp.pad(arr, pads)


def lora_matmul_kernel(x_ref, a_ref, b_ref, w_ref, o_ref, xa_ref, *,
                       compute_lora, tk):
    j = pl.program_id(1)
    k = pl.program_id(2)
    nk = pl.num_programs(2)

    x = x_ref[...]  # bf16 [TM, TK]

    # Base path: bf16 operands straight into the MXU, f32 accumulation into
    # the VMEM-resident output tile.
    partial = jnp.dot(x, w_ref[...], preferred_element_type=jnp.float32)

    @pl.when(k == 0)
    def _():
        o_ref[...] = partial

    @pl.when(k > 0)
    def _():
        o_ref[...] += partial

    if compute_lora:
        # x @ A is computed only once per (i, k) — the result is carried in
        # scratch across the whole j axis (grid order is i, j, k).
        @pl.when(j == 0)
        def _():
            a_tile = a_ref[pl.ds(pl.multiple_of(k * tk, tk), tk), :]
            xa = jnp.dot(x, a_tile, preferred_element_type=jnp.float32)

            @pl.when(k == 0)
            def _():
                xa_ref[...] = xa

            @pl.when(k > 0)
            def _():
                xa_ref[...] += xa

    @pl.when(k == nk - 1)
    def _():
        acc = o_ref[...]
        if compute_lora:
            # xa rounded to bf16 once, on the full K sum (matches reference),
            # then a single B dot per output tile.
            acc = acc + jnp.dot(xa_ref[...].astype(jnp.bfloat16), b_ref[...],
                                preferred_element_type=jnp.float32)
        # Single 16-bit rounding (mirrors the half-precision output of the
        # torch custom op), then widen to f32 (module returns .float()).
        o_ref[...] = acc.astype(jnp.bfloat16).astype(jnp.float32)


def lora_matmul(x, lora_a, lora_b, weight, scale, *, tm=512, tn=512, tk=512):
    """x: [..., in_feature] -> [..., out_feature] (float32)."""
    orig_shape = x.shape
    K = orig_shape[-1]
    N = lora_b.shape[-1]
    R = lora_a.shape[-1]

    # One-time bf16 cast of activations in the wrapper (the x tile is re-read
    # once per N tile in the kernel, so streaming it as bf16 is cheaper).
    x2 = x.reshape(-1, K).astype(jnp.bfloat16)
    M = x2.shape[0]

    # scale == 0 drops the LoRA path entirely (consistent with the custom
    # op's backward, which only uses W when scale == 0).  `scale` must be a
    # static Python scalar.
    compute_lora = (scale != 0) and (R > 0)
    inv_scale = (1.0 / float(scale)) if compute_lora else 0.0

    # Tile selection: dims smaller than the target become a single full block
    # (always legal); otherwise MXU/lane-aligned tiles with zero padding up
    # to a tile multiple.  N is padded to >=128 so output stores are
    # lane-dense.
    TM = tm if M >= tm else _round_up(M, 8)
    Mp = _round_up(M, TM)
    TK = tk if K >= tk else _round_up(K, 8)
    Kp = _round_up(K, TK)
    TN = tn if N >= tn else _round_up(N, 128)
    Np = _round_up(N, TN)
    # Rank padded to a full 128-lane tile so both LoRA dots are clean
    # full-lane MXU ops (A/B are tiny, padding cost is negligible).
    Rp = _round_up(max(R, 1), 128)

    # Weights cast to bf16 once per call; 1/scale folded into loraB so the
    # kernel has no per-tile scaling multiply.
    x_p = _pad_to(x2, (Mp, Kp))
    w_p = _pad_to(weight.astype(jnp.bfloat16), (Kp, Np))
    a_p = _pad_to(lora_a.astype(jnp.bfloat16), (Kp, Rp))
    b_scaled = (lora_b.astype(jnp.float32) * inv_scale).astype(jnp.bfloat16)
    b_p = _pad_to(b_scaled, (Rp, Np))

    kernel = functools.partial(lora_matmul_kernel,
                               compute_lora=compute_lora, tk=TK)

    out_p = pl.pallas_call(
        kernel,
        out_shape=jax.ShapeDtypeStruct((Mp, Np), jnp.float32),
        grid_spec=pltpu.PrefetchScalarGridSpec(
            num_scalar_prefetch=0,
            grid=(Mp // TM, Np // TN, Kp // TK),
            in_specs=[
                pl.BlockSpec((TM, TK), lambda i, j, k: (i, k)),   # x (bf16)
                pl.BlockSpec((Kp, Rp), lambda i, j, k: (0, 0)),   # loraA, VMEM-resident
                pl.BlockSpec((Rp, TN), lambda i, j, k: (0, j)),   # loraB * 1/scale
                pl.BlockSpec((TK, TN), lambda i, j, k: (k, j)),   # weight (bf16)
            ],
            out_specs=pl.BlockSpec((TM, TN), lambda i, j, k: (i, j)),
            scratch_shapes=[pltpu.VMEM((TM, Rp), jnp.float32)],   # xa accumulator
        ),
        compiler_params=pltpu.CompilerParams(
            # j carries the xa scratch across the grid, so it must stay
            # sequential; megacore parallelism is taken along M.
            dimension_semantics=("parallel", "arbitrary", "arbitrary"),
            vmem_limit_bytes=48 * 1024 * 1024,
        ),
    )(x_p, a_p, b_p, w_p)

    out = out_p[:M, :N]
    return out.reshape(*orig_shape[:-1], N)


if __name__ == "__main__":
    # Small shapes consistent with the module's forward.
    batch, seq = 2, 8
    in_feature, out_feature = 32, 64
    rank, alpha = 4, 8
    dropout_rate = 0.0  # -> nn.Identity, matching the Pallas path
    # TODO(synk): training-mode dropout (dropout_rate > 0) is not implemented.
    scale = alpha / rank

    key = jax.random.PRNGKey(0)
    kx, kw, ka, kb = jax.random.split(key, 4)
    x = jax.random.normal(kx, (batch, seq, in_feature), dtype=jnp.float32)
    weight = jax.random.normal(kw, (in_feature, out_feature), dtype=jnp.float32) * 0.05
    lora_a = jax.random.normal(ka, (in_feature, rank), dtype=jnp.float32) * 0.05
    lora_b = jax.random.normal(kb, (rank, out_feature), dtype=jnp.float32) * 0.05

    out = lora_matmul(x, lora_a, lora_b, weight, scale)
    jax.block_until_ready(out)

    # Reference mirroring the kernel's bf16 compute path (TPU-native stand-in
    # for torch's .half(); fp16-vs-bf16 numerics delta is accepted here).
    bf = jnp.bfloat16
    xb = x.reshape(-1, in_feature).astype(bf)
    wb = weight.astype(bf)
    ab = lora_a.astype(bf)
    bb = (lora_b * (1.0 / scale)).astype(bf)
    base = jnp.dot(xb, wb, preferred_element_type=jnp.float32)
    xa = jnp.dot(xb, ab, preferred_element_type=jnp.float32)
    lora = jnp.dot(xa.astype(bf), bb, preferred_element_type=jnp.float32)
    ref = (base + lora).astype(bf).astype(jnp.float32).reshape(batch, seq, out_feature)

    assert out.shape == (batch, seq, out_feature)
    assert out.dtype == jnp.float32
    assert jnp.allclose(out, ref, atol=2e-2, rtol=2e-2), float(jnp.max(jnp.abs(out - ref)))

    print("KERNEL_OK")
</pallas_src>

<mosaic_0001>
module attributes {stable_mosaic.version = 11 : i64} {
  func.func @lora_matmul_kernel(%arg0: i32, %arg1: i32, %arg2: i32, %arg3: memref<16x32xbf16, #tpu.memory_space<vmem>>, %arg4: memref<32x128xbf16, #tpu.memory_space<vmem>>, %arg5: memref<128x128xbf16, #tpu.memory_space<vmem>>, %arg6: memref<32x128xbf16, #tpu.memory_space<vmem>>, %arg7: memref<16x128xf32, #tpu.memory_space<vmem>>, %arg8: memref<16x128xf32, #tpu.memory_space<vmem>>) attributes {dimension_semantics = [#tpu.dimension_semantics<parallel>, #tpu.dimension_semantics<arbitrary>, #tpu.dimension_semantics<arbitrary>], iteration_bounds = array<i64: 1, 1, 1>, scalar_prefetch = 0 : i64, scratch_operands = 1 : i64, tpu.core_type = #tpu.core_type<tc>, window_params = [{transform_indices = @transform_0, window_bounds = array<i64: 16, 32>}, {pipeline_mode = #tpu.pipeline_mode<synchronous>, transform_indices = @transform_1, window_bounds = array<i64: 32, 128>}, {transform_indices = @transform_2, window_bounds = array<i64: 128, 128>}, {transform_indices = @transform_3, window_bounds = array<i64: 32, 128>}, {transform_indices = @transform_4, window_bounds = array<i64: 16, 128>}]} {
    %c0 = arith.constant 0 : index
    %c0_0 = arith.constant 0 : index
    %0 = vector.load %arg3[%c0, %c0_0] : memref<16x32xbf16, #tpu.memory_space<vmem>>, vector<16x32xbf16>
    %c0_1 = arith.constant 0 : index
    %c0_2 = arith.constant 0 : index
    %1 = vector.load %arg6[%c0_1, %c0_2] : memref<32x128xbf16, #tpu.memory_space<vmem>>, vector<32x128xbf16>
    %cst = arith.constant dense<0.000000e+00> : vector<16x128xf32>
    %2 = tpu.matmul %0, %1, %cst {dimension_numbers = #tpu.dot_dimension_numbers<[1], [0], [0], [1], [0, 0, 1, 1], [], []>} : vector<16x32xbf16>, vector<32x128xbf16>, vector<16x128xf32> -> vector<16x128xf32>
    %c0_i32 = arith.constant 0 : i32
    %3 = arith.cmpi eq, %arg2, %c0_i32 : i32
    %4 = arith.extui %3 : i1 to i32
    %c0_i32_3 = arith.constant 0 : i32
    %5 = arith.cmpi ne, %4, %c0_i32_3 : i32
    scf.if %5 {
      %c0_10 = arith.constant 0 : index
      %c0_11 = arith.constant 0 : index
      %15 = vector.load %arg7[%c0_10, %c0_11] : memref<16x128xf32, #tpu.memory_space<vmem>>, vector<16x128xf32>
      tpu.vector_store %arg7[%c0_10, %c0_11], %2 {strides = array<i32>} : memref<16x128xf32, #tpu.memory_space<vmem>>, vector<16x128xf32>,
    } else {
    }
    %c0_i32_4 = arith.constant 0 : i32
    %6 = arith.cmpi sgt, %arg2, %c0_i32_4 : i32
    %7 = arith.extui %6 : i1 to i32
    %c0_i32_5 = arith.constant 0 : i32
    %8 = arith.cmpi ne, %7, %c0_i32_5 : i32
    scf.if %8 {
      %c0_10 = arith.constant 0 : index
      %c0_11 = arith.constant 0 : index
      %15 = vector.load %arg7[%c0_10, %c0_11] : memref<16x128xf32, #tpu.memory_space<vmem>>, vector<16x128xf32>
      %16 = arith.addf %15, %2 : vector<16x128xf32>
      %c0_12 = arith.constant 0 : index
      %c0_13 = arith.constant 0 : index
      %17 = vector.load %arg7[%c0_12, %c0_13] : memref<16x128xf32, #tpu.memory_space<vmem>>, vector<16x128xf32>
      tpu.vector_store %arg7[%c0_12, %c0_13], %16 {strides = array<i32>} : memref<16x128xf32, #tpu.memory_space<vmem>>, vector<16x128xf32>,
    } else {
    }
    %c0_i32_6 = arith.constant 0 : i32
    %9 = arith.cmpi eq, %arg1, %c0_i32_6 : i32
    %10 = arith.extui %9 : i1 to i32
    %c0_i32_7 = arith.constant 0 : i32
    %11 = arith.cmpi ne, %10, %c0_i32_7 : i32
    scf.if %11 {
      %c32_i32 = arith.constant 32 : i32
      %15 = arith.muli %arg2, %c32_i32 : i32
      %16 = tpu.assume_multiple %15, 32 : i32
      %17 = arith.index_cast %16 : i32 to index
      %c0_10 = arith.constant 0 : index
      %18 = vector.load %arg4[%17, %c0_10] : memref<32x128xbf16, #tpu.memory_space<vmem>>, vector<32x128xbf16>
      %cst_11 = arith.constant dense<0.000000e+00> : vector<16x128xf32>
      %19 = tpu.matmul %0, %18, %cst_11 {dimension_numbers = #tpu.dot_dimension_numbers<[1], [0], [0], [1], [0, 0, 1, 1], [], []>} : vector<16x32xbf16>, vector<32x128xbf16>, vector<16x128xf32> -> vector<16x128xf32>
      %c0_i32_12 = arith.constant 0 : i32
      %20 = arith.cmpi eq, %arg2, %c0_i32_12 : i32
      %21 = arith.extui %20 : i1 to i32
      %c0_i32_13 = arith.constant 0 : i32
      %22 = arith.cmpi ne, %21, %c0_i32_13 : i32
      scf.if %22 {
        %c0_16 = arith.constant 0 : index
        %c0_17 = arith.constant 0 : index
        %26 = vector.load %arg8[%c0_16, %c0_17] : memref<16x128xf32, #tpu.memory_space<vmem>>, vector<16x128xf32>
        tpu.vector_store %arg8[%c0_16, %c0_17], %19 {strides = array<i32>} : memref<16x128xf32, #tpu.memory_space<vmem>>, vector<16x128xf32>,
      } else {
      }
      %c0_i32_14 = arith.constant 0 : i32
      %23 = arith.cmpi sgt, %arg2, %c0_i32_14 : i32
      %24 = arith.extui %23 : i1 to i32
      %c0_i32_15 = arith.constant 0 : i32
      %25 = arith.cmpi ne, %24, %c0_i32_15 : i32
      scf.if %25 {
        %c0_16 = arith.constant 0 : index
        %c0_17 = arith.constant 0 : index
        %26 = vector.load %arg8[%c0_16, %c0_17] : memref<16x128xf32, #tpu.memory_space<vmem>>, vector<16x128xf32>
        %27 = arith.addf %26, %19 : vector<16x128xf32>
        %c0_18 = arith.constant 0 : index
        %c0_19 = arith.constant 0 : index
        %28 = vector.load %arg8[%c0_18, %c0_19] : memref<16x128xf32, #tpu.memory_space<vmem>>, vector<16x128xf32>
        tpu.vector_store %arg8[%c0_18, %c0_19], %27 {strides = array<i32>} : memref<16x128xf32, #tpu.memory_space<vmem>>, vector<16x128xf32>,
      } else {
      }
    } else {
    }
    %c0_i32_8 = arith.constant 0 : i32
    %12 = arith.cmpi eq, %arg2, %c0_i32_8 : i32
    %13 = arith.extui %12 : i1 to i32
    %c0_i32_9 = arith.constant 0 : i32
    %14 = arith.cmpi ne, %13, %c0_i32_9 : i32
    scf.if %14 {
      %c0_10 = arith.constant 0 : index
      %c0_11 = arith.constant 0 : index
      %15 = vector.load %arg7[%c0_10, %c0_11] : memref<16x128xf32, #tpu.memory_space<vmem>>, vector<16x128xf32>
      %c0_12 = arith.constant 0 : index
      %c0_13 = arith.constant 0 : index
      %16 = vector.load %arg8[%c0_12, %c0_13] : memref<16x128xf32, #tpu.memory_space<vmem>>, vector<16x128xf32>
      %17 = arith.truncf %16 : vector<16x128xf32> to vector<16x128xbf16>
      %c0_14 = arith.constant 0 : index
      %c0_15 = arith.constant 0 : index
      %18 = vector.load %arg5[%c0_14, %c0_15] : memref<128x128xbf16, #tpu.memory_space<vmem>>, vector<128x128xbf16>
      %cst_16 = arith.constant dense<0.000000e+00> : vector<16x128xf32>
      %19 = tpu.matmul %17, %18, %cst_16 {dimension_numbers = #tpu.dot_dimension_numbers<[1], [0], [0], [1], [0, 0, 1, 1], [], []>} : vector<16x128xbf16>, vector<128x128xbf16>, vector<16x128xf32> -> vector<16x128xf32>
      %20 = arith.addf %15, %19 : vector<16x128xf32>
      %21 = arith.truncf %20 : vector<16x128xf32> to vector<16x128xbf16>
      %22 = arith.extf %21 : vector<16x128xbf16> to vector<16x128xf32>
      %c0_17 = arith.constant 0 : index
      %c0_18 = arith.constant 0 : index
      %23 = vector.load %arg7[%c0_17, %c0_18] : memref<16x128xf32, #tpu.memory_space<vmem>>, vector<16x128xf32>
      tpu.vector_store %arg7[%c0_17, %c0_18], %22 {strides = array<i32>} : memref<16x128xf32, #tpu.memory_space<vmem>>, vector<16x128xf32>,
    } else {
    }
    return
  }
  func.func @transform_0(%arg0: i32, %arg1: i32, %arg2: i32) -> (i32, i32) {
    %c0_i32 = arith.constant 0 : i32
    return %arg0, %arg2 : i32, i32
  }
  func.func @transform_1(%arg0: i32, %arg1: i32, %arg2: i32) -> (i32, i32) {
    %c0_i32 = arith.constant 0 : i32
    %c0_i32_0 = arith.constant 0 : i32
    %c0_i32_1 = arith.constant 0 : i32
    return %c0_i32, %c0_i32_0 : i32, i32
  }
  func.func @transform_2(%arg0: i32, %arg1: i32, %arg2: i32) -> (i32, i32) {
    %c0_i32 = arith.constant 0 : i32
    %c0_i32_0 = arith.constant 0 : i32
    return %c0_i32, %arg1 : i32, i32
  }
  func.func @transform_3(%arg0: i32, %arg1: i32, %arg2: i32) -> (i32, i32) {
    %c0_i32 = arith.constant 0 : i32
    return %arg2, %arg1 : i32, i32
  }
  func.func @transform_4(%arg0: i32, %arg1: i32, %arg2: i32) -> (i32, i32) {
    %c0_i32 = arith.constant 0 : i32
    return %arg0, %arg1 : i32, i32
  }
}

</mosaic_0001>

<bundles_post_ra>
// kernel: tpu_custom_call.1
= control target key start
LH: loop header
LB: loop body
LE: loop exit
PB: predicated region body
PF: predicated region fallthrough
CT: control target
= control target key end

     0   :  { %9 = vsyncpa [#allocation4], 0  ;;  %s720_s0 = inlined_call_operand.hbm [shape: bf16[16,32], index: 0, kind: input, shape index: {}]   ;;  %s721_s1 = inlined_call_operand.hbm [shape: bf16[32,128], index: 1, kind: input, shape index: {}]   ;;  %s722_s2 = inlined_call_operand.hbm [shape: bf16[128,128], index: 2, kind: input, shape index: {}]   ;;  %s723_s3 = inlined_call_operand.hbm [shape: bf16[32,128], index: 3, kind: input, shape index: {}]   ;;  %s724_s4 = inlined_call_operand.hbm [shape: f32[16,128], index: 4, kind: output, shape index: {}]  }
   0x1   :  { %10 = vsyncpa [#allocation7], 0 }
   0x2   :  { %11 = vsyncpa [#allocation10], 0 }
   0x3   :  { %12 = vsyncpa [#allocation5], 0  ;;  %s593_s15 = smov [#allocation6]   ;;  %s594_s17 = smov [#allocation3]  }
   0x4   :  { %s30_s16 = sshll.u32 %s593_s15, 4  ;;  %s18_s18 = sshll.u32 %s594_s17, 4  ;;  %s31_s16 = int_to_ptr.vmem [resolvable:$true] %s30_s16  ;;  %s629_s18 = int_to_ptr.vmem [resolvable:$true] %s18_s18 }
   0x5   :  { %s475_s21 = scalar_lea.hbm %s721_s1, 256 }
   0x6   :  { %p476_p0 = scmp.ne.s32.totalorder %s721_s1, %s475_s21  ;;  %p479_p1 = scmp.lt.u32.totalorder %s475_s21, %s721_s1 }
   0x8   :  { %p481_p2 = pnand %p479_p1, %p476_p0 }
   0xa   :  { %484 = shalt.err (!%p481_p2)
}
   0xb   :  { %s485_s26 = scalar_lea.vmem %s31_s16, 256  ;;  %p490_p4 = scmp.lt.s32.totalorder %s31_s16, %s31_s16 }
   0xc   :  { %p486_p3 = scmp.ne.s32.totalorder %s31_s16, %s485_s26  ;;  %p491_p5 = scmp.lt.s32.totalorder %s485_s26, %s485_s26 }
   0xe   :  { %p492_p6 = por %p491_p5, %p490_p4 }
  0x10   :  { %p493_p7 = pnand %p492_p6, %p486_p3 }
  0x12   :  { %496 = shalt.err (!%p493_p7)
}
  0x13   :  { %s595_s27 = smov 64   ;;  %s596_s28 = smov 4  }
  0x14   :  { %36 = dma.hbm_to_vmem [thread:$0]  %s721_s1, 256, %s31_s16, [#allocation7], %s595_s27, %s595_s27, %s596_s28  }
  0x15   :  { %s497_s7 = scalar_lea.hbm %s720_s0, 128 }
  0x16   :  { %p498_p8 = scmp.ne.s32.totalorder %s720_s0, %s497_s7  ;;  %p501_p9 = scmp.lt.u32.totalorder %s497_s7, %s720_s0 }
  0x18   :  { %p503_p10 = pnand %p501_p9, %p498_p8 }
  0x1a   :  { %506 = shalt.err (!%p503_p10)
}
  0x1b   :  { %s507_s12 = scalar_lea.vmem %s629_s18, 128  ;;  %p512_p12 = scmp.lt.s32.totalorder %s629_s18, %s629_s18 }
  0x1c   :  { %p508_p11 = scmp.ne.s32.totalorder %s629_s18, %s507_s12  ;;  %p513_p13 = scmp.lt.s32.totalorder %s507_s12, %s507_s12 }
  0x1e   :  { %p514_p0 = por %p513_p13, %p512_p12 }
  0x20   :  { %p515_p1 = pnand %p514_p0, %p508_p11 }
  0x22   :  { %518 = shalt.err (!%p515_p1)
}
  0x23   :  { %24 = dma.hbm_to_vmem [thread:$0]  %s720_s0, 128, %s629_s18, [#allocation4], %s595_s27, %s595_s27, %s596_s28  }
  0x24   :  { %s597_s14 = smov [#allocation8]   ;;  %s598_s16 = smov [#allocation9]  }
  0x25   :  { %s42_s15 = sshll.u32 %s597_s14, 4  ;;  %s54_s17 = sshll.u32 %s598_s16, 4  ;;  %s43_s15 = int_to_ptr.vmem [resolvable:$true] %s42_s15  ;;  %s666_s17 = int_to_ptr.vmem [resolvable:$true] %s54_s17 }
  0x26   :  { %s519_s21 = scalar_lea.hbm %s722_s2, 1024 }
  0x27   :  { %p520_p2 = scmp.ne.s32.totalorder %s722_s2, %s519_s21  ;;  %p523_p3 = scmp.lt.u32.totalorder %s519_s21, %s722_s2 }
  0x29   :  { %p525_p4 = pnand %p523_p3, %p520_p2 }
  0x2b   :  { %528 = shalt.err (!%p525_p4)
}
  0x2c   :  { %s529_s0 = scalar_lea.vmem %s43_s15, 1024  ;;  %p534_p6 = scmp.lt.s32.totalorder %s43_s15, %s43_s15 }
  0x2d   :  { %p530_p5 = scmp.ne.s32.totalorder %s43_s15, %s529_s0  ;;  %p535_p7 = scmp.lt.s32.totalorder %s529_s0, %s529_s0 }
  0x2f   :  { %p536_p8 = por %p535_p7, %p534_p6 }
  0x31   :  { %p537_p9 = pnand %p536_p8, %p530_p5 }
  0x33   :  { %540 = shalt.err (!%p537_p9)
}
  0x34   :  { %48 = dma.hbm_to_vmem [thread:$0]  %s722_s2, 1024, %s43_s15, [#allocation7], %s595_s27, %s595_s27, %s596_s28  }
  0x35   :  { %s541_s5 = scalar_lea.hbm %s723_s3, 256 }
  0x36   :  { %p542_p10 = scmp.ne.s32.totalorder %s723_s3, %s541_s5  ;;  %p545_p11 = scmp.lt.u32.totalorder %s541_s5, %s723_s3 }
  0x38   :  { %p547_p12 = pnand %p545_p11, %p542_p10 }
  0x3a   :  { %550 = shalt.err (!%p547_p12)
}
  0x3b   :  { %s551_s10 = scalar_lea.vmem %s666_s17, 256  ;;  %p556_p0 = scmp.lt.s32.totalorder %s666_s17, %s666_s17 }
  0x3c   :  { %p552_p13 = scmp.ne.s32.totalorder %s666_s17, %s551_s10  ;;  %p557_p1 = scmp.lt.s32.totalorder %s551_s10, %s551_s10 }
  0x3e   :  { %p558_p2 = por %p557_p1, %p556_p0 }
  0x40   :  { %p559_p3 = pnand %p558_p2, %p552_p13 }
  0x42   :  { %562 = shalt.err (!%p559_p3)
}
  0x43   :  { %60 = dma.hbm_to_vmem [thread:$0]  %s723_s3, 256, %s666_s17, [#allocation10], %s595_s27, %s595_s27, %s596_s28  }
  0x44   :  { %585 = dma.done.wait [#allocation4], 128  }
  0x45   :  { %586 = vsyncadd [#allocation4], 4294967168 }
  0x46   :  { %587 = dma.done.wait [#allocation7], 1280  }
  0x47   :  { %588 = vsyncadd [#allocation7], 4294966016 }
  0x48   :  { %589 = dma.done.wait [#allocation10], 256  }
  0x49   :  { %590 = vsyncadd [#allocation10], 4294967040  ;;  %v599_v0 = vmov 0.0   ;;  %vm600_vm0 = vmmov 0   ;;  %v462_v1 = vld [vmem:[#allocation9] sm:$0xff]   ;;  %v463_v2 = vld [vmem:[#allocation9 + $0x8] sm:$0xff]  }
  0x4a   :  { %409 = vmatprep.subr.bf16.mxu1 %v599_v0  ;;  %413 = vmatprep.mubr.msk.bf16.mxu1 %vm600_vm0, %v599_v0  ;;  %v464_v3 = vld [vmem:[#allocation3] sm:$0xff]   ;;  %v467_v4 = vld [vmem:[#allocation8] sm:$0xff]   ;;  %vm97_vm1 = vcmask 261120   ;;  %v465_v5 = vld [vmem:[#allocation6] sm:$0xff]   ;;  %s601_s3 = smov [#allocation11]  }
  0x4b   :  { %425 = vmatprep.subr.bf16.mxu0 %v599_v0  ;;  %441 = vmatprep.mubr.msk.bf16.mxu0 %vm600_vm0, %v599_v0  ;;  %v468_v6 = vld [vmem:[#allocation8 + $0x8] sm:$0xff]   ;;  %v466_v7 = vld [vmem:[#allocation6 + $0x8] sm:$0xff]   ;;  %v469_v8 = vld [vmem:[#allocation8 + $0x10] sm:$0xff]   ;;  %s363_s27 = sshll.u32 %s601_s3, 4  ;;  %s364_s27 = int_to_ptr.vmem [resolvable:$true] %s363_s27 }
  0x4c   :  { %410 = vmatpush3.bf16.msra.mxu1 %v462_v1  ;;  %426 = vmatpush3.bf16.msra.mxu0 %v467_v4  ;;  %v470_v9 = vld [vmem:[#allocation8 + $0x18] sm:$0xff]   ;;  %v471_v10 = vld [vmem:[#allocation8 + $0x20] sm:$0xff]   ;;  %v472_v11 = vld [vmem:[#allocation8 + $0x28] sm:$0xff]   ;;  %s563_s28 = scalar_lea.vmem %s364_s27, 256  ;;  %p568_p5 = scmp.lt.s32.totalorder %s364_s27, %s364_s27 }
  0x4d   :  { %411 = vmatprep.subr.bf16.mxu1 %v599_v0  ;;  %427 = vmatprep.subr.bf16.mxu0 %v599_v0  ;;  %v473_v12 = vld [vmem:[#allocation8 + $0x30] sm:$0xff]   ;;  %v474_v13 = vld [vmem:[#allocation8 + $0x38] sm:$0xff]   ;;  %p564_p4 = scmp.ne.s32.totalorder %s364_s27, %s563_s28  ;;  %p569_p6 = scmp.lt.s32.totalorder %s563_s28, %s563_s28 }
  0x4f   :  { %p570_p7 = por %p569_p6, %p568_p5 }
  0x50   :  { %412 = vmatpush3.bf16.msra.mxu1 %v463_v2  ;;  %428 = vmatpush3.bf16.msra.mxu0 %v468_v6 }
  0x51   :  { %417 = vmatprep.subr.bf16.mxu1 %v599_v0  ;;  %429 = vmatprep.subr.bf16.mxu0 %v599_v0  ;;  %p571_p8 = pnand %p570_p7, %p564_p4 }
  0x53   :  { %414 = vmatmul.mubr.msk.bf16.vlgmr.msra.gmra.mrb[0].mxu1 %vm97_vm1, %v464_v3 }
  0x54   :  { %418 = vmatpush3.bf16.msra.mxu1 %v465_v5  ;;  %421 = vmatprep.mubr.msk.bf16.mxu1 %vm600_vm0, %v599_v0 }
  0x55   :  { %419 = vmatprep.subr.bf16.mxu1 %v599_v0  ;;  %430 = vmatpush3.bf16.msra.mxu0 %v469_v8 }
  0x56   :  { %431 = vmatprep.subr.bf16.mxu0 %v599_v0 }
  0x58   :  { %420 = vmatpush3.bf16.msra.mxu1 %v466_v7 }
  0x59   :  { %432 = vmatpush3.bf16.msra.mxu0 %v470_v9 }
  0x5a   :  { %433 = vmatprep.subr.bf16.mxu0 %v599_v0 }
  0x5b   :  { %422 = vmatmul.mubr.msk.bf16.vlgmr.msra.gmra.mrb[4].mxu1 %vm97_vm1, %v464_v3 }
  0x5d   :  { %434 = vmatpush3.bf16.msra.mxu0 %v471_v10 }
  0x5e   :  { %435 = vmatprep.subr.bf16.mxu0 %v599_v0 }
  0x61   :  { %436 = vmatpush3.bf16.msra.mxu0 %v472_v11 }
  0x62   :  { %437 = vmatprep.subr.bf16.mxu0 %v599_v0 }
  0x65   :  { %438 = vmatpush3.bf16.msra.mxu0 %v473_v12 }
  0x66   :  { %439 = vmatprep.subr.bf16.mxu0 %v599_v0 }
  0x69   :  { %440 = vmatpush3.bf16.msra.mxu0 %v474_v13 }
 0x126   :  { %v135_v14 = vpop.f32.mrb[0].mxu1 }
 0x127   :  { %v415_v15 = vpop.f32.mrb[1].mxu1 }
 0x128   :  { %v138_v16 = vpop.f32.mrb[2].mxu1 }
 0x129   :  { %v416_v17 = vpop.f32.mrb[3].mxu1 }
 0x12e   :  { %v217_v18 = vpop.f32.mrb[4].mxu1 }
 0x12f   :  { %v423_v19 = vpop.f32.mrb[5].mxu1 }
 0x130   :  { %v220_v20 = vpop.f32.mrb[6].mxu1 }
 0x131   :  { %v245_v21 = vpack.c.bf16 %v220_v20, %v217_v18  ;;  %v424_v22 = vpop.f32.mrb[7].mxu1 }
 0x133   :  { %442 = vmatmul.mubr.bf16.vlgmr.msra.gmra.mrb[0].mxu0 %v245_v21 }
 0x206   :  { %v344_v23 = vpop.f32.mrb[0].mxu0 }
 0x207   :  { %v447_v24 = vadd.f32 %v344_v23, %v135_v14  ;;  %v443_v25 = vpop.f32.mrb[1].mxu0 }
 0x208   :  { %v347_v26 = vpop.f32.mrb[2].mxu0 }
 0x209   :  { %v450_v27 = vadd.f32 %v347_v26, %v138_v16  ;;  %v444_v28 = vpop.f32.mrb[3].mxu0 }
 0x20b   :  { %v353_v29 = vpack.c.bf16 %v450_v27, %v447_v24 }
 0x20d   :  { %v354_v30 = vunpack.c.l.bf16 %v353_v29  ;;  %v355_v31 = vunpack.c.h.bf16 %v353_v29 }
 0x20f   :  { %357 = vst [vmem:[#allocation11 + $0x8] sm:$0xff] %v355_v31  ;;  %356 = vst [vmem:[#allocation11] sm:$0xff] %v354_v30 }
 0x210   :  { %574 = shalt.err (!%p571_p8)
}
 0x211   :  { %s575_s13 = scalar_lea.hbm %s724_s4, 256 }
 0x212   :  { %p576_p9 = scmp.ne.s32.totalorder %s724_s4, %s575_s13  ;;  %p579_p10 = scmp.lt.u32.totalorder %s575_s13, %s724_s4 }
 0x214   :  { %p581_p11 = pnand %p579_p10, %p576_p9 }
 0x216   :  { %584 = shalt.err (!%p581_p11)
}
 0x217   :  { %s602_s19 = smov 128   ;;  %s603_s20 = smov 8  }
 0x218   :  { %369 = dma.vmem_to_hbm [thread:$0]  %s364_s27, 256, %s724_s4, [#allocation5], %s602_s19, %s602_s19, %s603_s20  }
 0x219   :  { %591 = dma.done.wait [#allocation5], 256  }
 0x21a   :  { %592 = vsyncadd [#allocation5], 4294967040 }
 0x21b   :  { %373 = vsyncpa [#allocation4], 1 }
 0x21c   :  { %374 = vsyncpa [#allocation7], 1 }
 0x21d   :  { %375 = vsyncpa [#allocation10], 1 }
 0x21e   :  { %376 = vsyncpa [#allocation5], 1 }

</bundles_post_ra>
